<compile_context>
chip_gen: v7x
topology: tpu7x:2x2x1
jax: 0.10.0
libtpu: 0.0.40
codegen_flags: <defaults>
</compile_context>

<pallas_src>
import jax
import jax.numpy as jnp
from jax.experimental import pallas as pl
from jax.experimental.pallas import tpu as pltpu


def mlp_kernel(xT_ref, w1_ref, b1_ref, w2_ref, b2_ref,
               w3_ref, b3_ref, w4_ref, b4_ref, out_ref):
    xT = xT_ref[...]                                      # (2, TILE_B), batch on lanes
    w1 = w1_ref[...]                                      # (72, 2)

    # Layer 1 (2 -> 72): K=2 would leave the MXU <2% utilized -> VPU broadcast FMAs.
    h = (w1[:, 0:1] * xT[0:1, :]
         + w1[:, 1:2] * xT[1:2, :]
         + b1_ref[...])                                   # (72, TILE_B)
    h = jnp.maximum(h, 0.0)

    # Layer 2 (72 -> 100): MXU, f32 (tolerance-bound, nowhere near MXU roofline).
    h = jnp.dot(w2_ref[...], h, preferred_element_type=jnp.float32) + b2_ref[...]
    h = jnp.maximum(h, 0.0)                               # (100, TILE_B)

    # Layer 3 (100 -> 10): MXU.
    h = jnp.dot(w3_ref[...], h, preferred_element_type=jnp.float32) + b3_ref[...]
    h = jnp.maximum(h, 0.0)                               # (10, TILE_B)

    # Layer 4 (10 -> 1): N=1 -> VPU multiply + sublane (XLU) reduction.
    logits = jnp.sum(w4_ref[...] * h, axis=0, keepdims=True) + b4_ref[...]  # (1, TILE_B)

    # Sigmoid: exp on the EUP; exact divide keeps us within 1e-5 of the f32 reference.
    out_ref[...] = 1.0 / (1.0 + jnp.exp(-logits))


_MAX_TILE_B = 8192   # ~6 MiB of f32 intermediates + double-buffered x/out: fits the
                     # 32 MiB default scoped VMEM on v5e/v6e/v7x, no vmem_limit needed.


def _choose_tile_b(batch):
    """Pick a lane-aligned batch tile.

    Small batches: one tile, padded only up to the next multiple of 128.
    Large batches: tiles up to 8192 to amortize the ~0.35us/step pipeline
    overhead, halved until there are >= 2 tiles so v7x's two TensorCores
    (dimension_semantics=("parallel",)) both get work.
    """
    if batch <= 2048:
        return max(128, -(-batch // 128) * 128)
    tb = _MAX_TILE_B
    while tb > 1024 and -(-batch // tb) < 2:
        tb //= 2
    return tb


def mlp_forward(x, params, *, tile_b=None):
    """x: (batch, 2) f32.  params: PyTorch layout [(w (out,in), b (out,)), ...]."""
    (w1, b1), (w2, b2), (w3, b3), (w4, b4) = params
    batch = x.shape[0]
    if tile_b is None:
        tile_b = _choose_tile_b(batch)
    num_tiles = -(-batch // tile_b)
    batch_p = num_tiles * tile_b

    # Lane-dense input slab (2, batch_p). Fast path: plain transpose; only pad
    # the tail when batch isn't a tile multiple (no zeros+update_slice slab).
    xT = x.T.astype(jnp.float32)
    if batch_p != batch:
        xT = jnp.pad(xT, ((0, 0), (0, batch_p - batch)))

    # Biases as columns so they broadcast over the lane (batch) axis.
    b1c = b1.reshape(-1, 1)
    b2c = b2.reshape(-1, 1)
    b3c = b3.reshape(-1, 1)
    w4c = w4.reshape(-1, 1)        # (1, 10) -> (10, 1)
    b4c = b4.reshape(1, 1)

    def const_spec(shape):
        # Full-array block, constant index -> DMA'd once, VMEM-resident across the grid.
        return pl.BlockSpec(shape, lambda i: (0, 0))

    # Note: packing the 8 small weight/bias operands into one slab was
    # considered (fewer BlockSpecs / one-time DMAs) but the win is a few KiB of
    # VMEM and setup latency only; kept separate for clarity.
    out = pl.pallas_call(
        mlp_kernel,
        out_shape=jax.ShapeDtypeStruct((1, batch_p), jnp.float32),
        grid=(num_tiles,),
        in_specs=[
            pl.BlockSpec((2, tile_b), lambda i: (0, i)),   # pipelined batch tile
            const_spec(w1.shape), const_spec(b1c.shape),
            const_spec(w2.shape), const_spec(b2c.shape),
            const_spec(w3.shape), const_spec(b3c.shape),
            const_spec(w4c.shape), const_spec(b4c.shape),
        ],
        out_specs=pl.BlockSpec((1, tile_b), lambda i: (0, i)),   # lane-dense output slab
        compiler_params=pltpu.CompilerParams(
            dimension_semantics=("parallel",)),                  # shard batch across TCs (v7x)
    )(xT, w1, b1c, w2, b2c, w3, b3c, w4c, b4c)

    return out[0, :batch].reshape(batch, 1)


def init_params(key):
    """Deterministic init matching nn.Linear shapes (PyTorch layout: w (out, in), b (out,))."""
    dims = [(2, 72), (72, 100), (100, 10), (10, 1)]
    params = []
    for i, (fan_in, fan_out) in enumerate(dims):
        kw, kb = jax.random.split(jax.random.fold_in(key, i))
        bound = 1.0 / jnp.sqrt(float(fan_in))
        w = jax.random.uniform(kw, (fan_out, fan_in), jnp.float32, -bound, bound)
        b = jax.random.uniform(kb, (fan_out,), jnp.float32, -bound, bound)
        params.append((w, b))
    return params


def mlp_reference(x, params):
    h = x
    for i, (w, b) in enumerate(params):
        h = h @ w.T + b
        if i < 3:
            h = jnp.maximum(h, 0.0)
    return 1.0 / (1.0 + jnp.exp(-h))


if __name__ == "__main__":
    key = jax.random.PRNGKey(0)
    kx, kp = jax.random.split(key)
    params = init_params(kp)

    # Small batch: single grid step, exercises tail padding + adaptive tile choice.
    x_small = jax.random.normal(kx, (8, 2), dtype=jnp.float32)
    out_small = jax.block_until_ready(mlp_forward(x_small, params))
    ref_small = mlp_reference(x_small, params)
    assert out_small.shape == (8, 1)
    assert jnp.allclose(out_small, ref_small, atol=1e-5, rtol=1e-5)

    # Multi-tile batch with an explicit small tile: exercises grid pipelining,
    # tail padding on the last tile, and the parallel batch axis, while keeping
    # the test shapes small.
    x_multi = jax.random.normal(jax.random.fold_in(kx, 1), (300, 2), dtype=jnp.float32)
    out_multi = jax.block_until_ready(mlp_forward(x_multi, params, tile_b=128))
    ref_multi = mlp_reference(x_multi, params)
    assert out_multi.shape == (300, 1)
    assert jnp.allclose(out_multi, ref_multi, atol=1e-5, rtol=1e-5)

    # Default (adaptive) tile path on a non-tile-multiple batch.
    x_big = jax.random.normal(jax.random.fold_in(kx, 2), (1030, 2), dtype=jnp.float32)
    out_big = jax.block_until_ready(mlp_forward(x_big, params))
    ref_big = mlp_reference(x_big, params)
    assert out_big.shape == (1030, 1)
    assert jnp.allclose(out_big, ref_big, atol=1e-5, rtol=1e-5)

    print("KERNEL_OK")
</pallas_src>

<mosaic_0001>
module attributes {stable_mosaic.version = 11 : i64} {
  func.func @mlp_kernel(%arg0: i32, %arg1: memref<2x128xf32, #tpu.memory_space<vmem>>, %arg2: memref<72x2xf32, #tpu.memory_space<vmem>>, %arg3: memref<72x1xf32, #tpu.memory_space<vmem>>, %arg4: memref<100x72xf32, #tpu.memory_space<vmem>>, %arg5: memref<100x1xf32, #tpu.memory_space<vmem>>, %arg6: memref<10x100xf32, #tpu.memory_space<vmem>>, %arg7: memref<10x1xf32, #tpu.memory_space<vmem>>, %arg8: memref<10x1xf32, #tpu.memory_space<vmem>>, %arg9: memref<1x1xf32, #tpu.memory_space<vmem>>, %arg10: memref<1x128xf32, #tpu.memory_space<vmem>>) attributes {dimension_semantics = [#tpu.dimension_semantics<parallel>], iteration_bounds = array<i64: 1>, scalar_prefetch = 0 : i64, scratch_operands = 0 : i64, tpu.core_type = #tpu.core_type<tc>, window_params = [{transform_indices = @transform_0, window_bounds = array<i64: 2, 128>}, {pipeline_mode = #tpu.pipeline_mode<synchronous>, transform_indices = @transform_1, window_bounds = array<i64: 72, 2>}, {pipeline_mode = #tpu.pipeline_mode<synchronous>, transform_indices = @transform_2, window_bounds = array<i64: 72, 1>}, {pipeline_mode = #tpu.pipeline_mode<synchronous>, transform_indices = @transform_3, window_bounds = array<i64: 100, 72>}, {pipeline_mode = #tpu.pipeline_mode<synchronous>, transform_indices = @transform_4, window_bounds = array<i64: 100, 1>}, {pipeline_mode = #tpu.pipeline_mode<synchronous>, transform_indices = @transform_5, window_bounds = array<i64: 10, 100>}, {pipeline_mode = #tpu.pipeline_mode<synchronous>, transform_indices = @transform_6, window_bounds = array<i64: 10, 1>}, {pipeline_mode = #tpu.pipeline_mode<synchronous>, transform_indices = @transform_7, window_bounds = array<i64: 10, 1>}, {pipeline_mode = #tpu.pipeline_mode<synchronous>, transform_indices = @transform_8, window_bounds = array<i64: 1, 1>}, {transform_indices = @transform_9, window_bounds = array<i64: 1, 128>}]} {
    %c0 = arith.constant 0 : index
    %c0_0 = arith.constant 0 : index
    %0 = vector.load %arg1[%c0, %c0_0] : memref<2x128xf32, #tpu.memory_space<vmem>>, vector<2x128xf32>
    %c0_1 = arith.constant 0 : index
    %c0_2 = arith.constant 0 : index
    %1 = vector.load %arg2[%c0_1, %c0_2] : memref<72x2xf32, #tpu.memory_space<vmem>>, vector<72x2xf32>
    %2 = vector.extract_strided_slice %1 {offsets = [0, 0], sizes = [72, 1], strides = [1, 1]} : vector<72x2xf32> to vector<72x1xf32>
    %3 = vector.extract_strided_slice %0 {offsets = [0, 0], sizes = [1, 128], strides = [1, 1]} : vector<2x128xf32> to vector<1x128xf32>
    %4 = vector.broadcast %2 : vector<72x1xf32> to vector<72x128xf32>
    %5 = vector.broadcast %3 : vector<1x128xf32> to vector<72x128xf32>
    %6 = arith.mulf %4, %5 : vector<72x128xf32>
    %7 = vector.extract_strided_slice %1 {offsets = [0, 1], sizes = [72, 1], strides = [1, 1]} : vector<72x2xf32> to vector<72x1xf32>
    %8 = vector.extract_strided_slice %0 {offsets = [1, 0], sizes = [1, 128], strides = [1, 1]} : vector<2x128xf32> to vector<1x128xf32>
    %9 = vector.broadcast %7 : vector<72x1xf32> to vector<72x128xf32>
    %10 = vector.broadcast %8 : vector<1x128xf32> to vector<72x128xf32>
    %11 = arith.mulf %9, %10 : vector<72x128xf32>
    %12 = arith.addf %6, %11 : vector<72x128xf32>
    %c0_3 = arith.constant 0 : index
    %c0_4 = arith.constant 0 : index
    %13 = vector.load %arg3[%c0_3, %c0_4] : memref<72x1xf32, #tpu.memory_space<vmem>>, vector<72x1xf32>
    %14 = vector.broadcast %13 : vector<72x1xf32> to vector<72x128xf32>
    %15 = arith.addf %12, %14 : vector<72x128xf32>
    %cst = arith.constant 0.000000e+00 : f32
    %16 = vector.broadcast %cst : f32 to vector<72x128xf32>
    %17 = arith.maximumf %15, %16 : vector<72x128xf32>
    %c0_5 = arith.constant 0 : index
    %c0_6 = arith.constant 0 : index
    %18 = vector.load %arg4[%c0_5, %c0_6] : memref<100x72xf32, #tpu.memory_space<vmem>>, vector<100x72xf32>
    %cst_7 = arith.constant dense<0.000000e+00> : vector<100x128xf32>
    %19 = tpu.matmul %18, %17, %cst_7 {dimension_numbers = #tpu.dot_dimension_numbers<[1], [0], [0], [1], [0, 0, 1, 1], [], []>} : vector<100x72xf32>, vector<72x128xf32>, vector<100x128xf32> -> vector<100x128xf32>
    %c0_8 = arith.constant 0 : index
    %c0_9 = arith.constant 0 : index
    %20 = vector.load %arg5[%c0_8, %c0_9] : memref<100x1xf32, #tpu.memory_space<vmem>>, vector<100x1xf32>
    %21 = vector.broadcast %20 : vector<100x1xf32> to vector<100x128xf32>
    %22 = arith.addf %19, %21 : vector<100x128xf32>
    %cst_10 = arith.constant 0.000000e+00 : f32
    %23 = vector.broadcast %cst_10 : f32 to vector<100x128xf32>
    %24 = arith.maximumf %22, %23 : vector<100x128xf32>
    %c0_11 = arith.constant 0 : index
    %c0_12 = arith.constant 0 : index
    %25 = vector.load %arg6[%c0_11, %c0_12] : memref<10x100xf32, #tpu.memory_space<vmem>>, vector<10x100xf32>
    %cst_13 = arith.constant dense<0.000000e+00> : vector<10x128xf32>
    %26 = tpu.matmul %25, %24, %cst_13 {dimension_numbers = #tpu.dot_dimension_numbers<[1], [0], [0], [1], [0, 0, 1, 1], [], []>} : vector<10x100xf32>, vector<100x128xf32>, vector<10x128xf32> -> vector<10x128xf32>
    %c0_14 = arith.constant 0 : index
    %c0_15 = arith.constant 0 : index
    %27 = vector.load %arg7[%c0_14, %c0_15] : memref<10x1xf32, #tpu.memory_space<vmem>>, vector<10x1xf32>
    %28 = vector.broadcast %27 : vector<10x1xf32> to vector<10x128xf32>
    %29 = arith.addf %26, %28 : vector<10x128xf32>
    %cst_16 = arith.constant 0.000000e+00 : f32
    %30 = vector.broadcast %cst_16 : f32 to vector<10x128xf32>
    %31 = arith.maximumf %29, %30 : vector<10x128xf32>
    %c0_17 = arith.constant 0 : index
    %c0_18 = arith.constant 0 : index
    %32 = vector.load %arg8[%c0_17, %c0_18] : memref<10x1xf32, #tpu.memory_space<vmem>>, vector<10x1xf32>
    %33 = vector.broadcast %32 : vector<10x1xf32> to vector<10x128xf32>
    %34 = arith.mulf %33, %31 : vector<10x128xf32>
    %cst_19 = arith.constant dense<0.000000e+00> : vector<128xf32>
    %35 = vector.multi_reduction <add>, %34, %cst_19 [0] : vector<10x128xf32> to vector<128xf32>
    %36 = vector.shape_cast %35 : vector<128xf32> to vector<1x128xf32>
    %c0_20 = arith.constant 0 : index
    %c0_21 = arith.constant 0 : index
    %37 = vector.load %arg9[%c0_20, %c0_21] : memref<1x1xf32, #tpu.memory_space<vmem>>, vector<1x1xf32>
    %38 = vector.broadcast %37 : vector<1x1xf32> to vector<1x128xf32>
    %39 = arith.addf %36, %38 : vector<1x128xf32>
    %cst_22 = arith.constant 0.000000e+00 : f32
    %40 = vector.broadcast %cst_22 : f32 to vector<1x128xf32>
    %41 = arith.subf %40, %39 : vector<1x128xf32>
    %42 = math.exp %41 : vector<1x128xf32>
    %cst_23 = arith.constant 1.000000e+00 : f32
    %43 = vector.broadcast %cst_23 : f32 to vector<1x128xf32>
    %44 = arith.addf %43, %42 : vector<1x128xf32>
    %cst_24 = arith.constant 1.000000e+00 : f32
    %45 = vector.broadcast %cst_24 : f32 to vector<1x128xf32>
    %46 = arith.divf %45, %44 : vector<1x128xf32>
    %c0_25 = arith.constant 0 : index
    %c0_26 = arith.constant 0 : index
    %47 = vector.load %arg10[%c0_25, %c0_26] : memref<1x128xf32, #tpu.memory_space<vmem>>, vector<1x128xf32>
    tpu.vector_store %arg10[%c0_25, %c0_26], %46 {strides = array<i32>} : memref<1x128xf32, #tpu.memory_space<vmem>>, vector<1x128xf32>,
    return
  }
  func.func @transform_0(%arg0: i32) -> (i32, i32) {
    %c0_i32 = arith.constant 0 : i32
    %c0_i32_0 = arith.constant 0 : i32
    return %c0_i32, %arg0 : i32, i32
  }
  func.func @transform_1(%arg0: i32) -> (i32, i32) {
    %c0_i32 = arith.constant 0 : i32
    %c0_i32_0 = arith.constant 0 : i32
    %c0_i32_1 = arith.constant 0 : i32
    return %c0_i32, %c0_i32_0 : i32, i32
  }
  func.func @transform_2(%arg0: i32) -> (i32, i32) {
    %c0_i32 = arith.constant 0 : i32
    %c0_i32_0 = arith.constant 0 : i32
    %c0_i32_1 = arith.constant 0 : i32
    return %c0_i32, %c0_i32_0 : i32, i32
  }
  func.func @transform_3(%arg0: i32) -> (i32, i32) {
    %c0_i32 = arith.constant 0 : i32
    %c0_i32_0 = arith.constant 0 : i32
    %c0_i32_1 = arith.constant 0 : i32
    return %c0_i32, %c0_i32_0 : i32, i32
  }
  func.func @transform_4(%arg0: i32) -> (i32, i32) {
    %c0_i32 = arith.constant 0 : i32
    %c0_i32_0 = arith.constant 0 : i32
    %c0_i32_1 = arith.constant 0 : i32
    return %c0_i32, %c0_i32_0 : i32, i32
  }
  func.func @transform_5(%arg0: i32) -> (i32, i32) {
    %c0_i32 = arith.constant 0 : i32
    %c0_i32_0 = arith.constant 0 : i32
    %c0_i32_1 = arith.constant 0 : i32
    return %c0_i32, %c0_i32_0 : i32, i32
  }
  func.func @transform_6(%arg0: i32) -> (i32, i32) {
    %c0_i32 = arith.constant 0 : i32
    %c0_i32_0 = arith.constant 0 : i32
    %c0_i32_1 = arith.constant 0 : i32
    return %c0_i32, %c0_i32_0 : i32, i32
  }
  func.func @transform_7(%arg0: i32) -> (i32, i32) {
    %c0_i32 = arith.constant 0 : i32
    %c0_i32_0 = arith.constant 0 : i32
    %c0_i32_1 = arith.constant 0 : i32
    return %c0_i32, %c0_i32_0 : i32, i32
  }
  func.func @transform_8(%arg0: i32) -> (i32, i32) {
    %c0_i32 = arith.constant 0 : i32
    %c0_i32_0 = arith.constant 0 : i32
    %c0_i32_1 = arith.constant 0 : i32
    return %c0_i32, %c0_i32_0 : i32, i32
  }
  func.func @transform_9(%arg0: i32) -> (i32, i32) {
    %c0_i32 = arith.constant 0 : i32
    %c0_i32_0 = arith.constant 0 : i32
    return %c0_i32, %arg0 : i32, i32
  }
}

</mosaic_0001>

<bundles_post_ra>
// kernel: tpu_custom_call.1
= control target key start
LH: loop header
LB: loop body
LE: loop exit
PB: predicated region body
PF: predicated region fallthrough
CT: control target
= control target key end

     0   :  { %s1197_s0 = inlined_call_operand.vmem [shape: f32[2,128], index: 0, kind: input, shape index: {}]   ;;  %s1198_s1 = inlined_call_operand.vmem [shape: f32[72,2], index: 1, kind: input, shape index: {}]   ;;  %s1199_s2 = inlined_call_operand.vmem [shape: f32[72,1], index: 2, kind: input, shape index: {}]   ;;  %s1200_s3 = inlined_call_operand.vmem [shape: f32[100,72], index: 3, kind: input, shape index: {}]   ;;  %s1201_s4 = inlined_call_operand.vmem [shape: f32[100,1], index: 4, kind: input, shape index: {}]   ;;  %s1202_s5 = inlined_call_operand.vmem [shape: f32[10,100], index: 5, kind: input, shape index: {}]   ;;  %s1203_s6 = inlined_call_operand.vmem [shape: f32[10,1], index: 6, kind: input, shape index: {}]   ;;  %s1204_s7 = inlined_call_operand.vmem [shape: f32[10,1], index: 7, kind: input, shape index: {}]   ;;  %s1205_s8 = inlined_call_operand.<no memory space> [shape: f32[1,1], index: 8, kind: input, shape index: {}]   ;;  %s1206_s9 = inlined_call_operand.hbm [shape: f32[1,128], index: 9, kind: output, shape index: {}]  }
   0x1   :  { %v14_v0 = vstv %s1205_s8 }
   0x2   :  { %15 = vst [vmem:[#allocation2] sm:$0x1] %v14_v0 }
   0x3   :  { %v38_v1 = vld [vmem:[%s1198_s1 + $0x10] sm:$0xff]  ;;  %v36_v2 = vld [vmem:[%s1198_s1] sm:$0xff]  ;;  %v885_v3 = vmov 1   ;;  %v37_v5 = vld [vmem:[%s1198_s1 + $0x8] sm:$0xff] }
   0x4   :  { %847 = vset.pattern.permute.xlu0 %v885_v3  ;;  %845 = vset.pattern.permute.xlu1 %v885_v3  ;;  %v40_v4 = vld [vmem:[%s1198_s1 + $0x20] sm:$0xff]  ;;  %v42_v6 = vld [vmem:[%s1198_s1 + $0x30] sm:$0xff]  ;;  %v39_v7 = vld [vmem:[%s1198_s1 + $0x18] sm:$0xff] }
   0x5   :  { %112 = vperm.xlu0 %847, %v38_v1   ;;  %104 = vperm.xlu1 %845, %v36_v2  }
   0x9   :  { %120 = vperm.xlu0 %847, %v40_v4   ;;  %108 = vperm.xlu1 %845, %v37_v5  }
   0xa   :  { %16 = vsyncpa [#allocation4], 0  ;;  %v886_v8 = vmov 0   ;;  %v161_v9 = vld [vmem:[%s1199_s2] sm:$0xff]  ;;  %v162_v10 = vld [vmem:[%s1199_s2 + $0x8] sm:$0xff]  ;;  %v887_v14 = vmov 0.0|0.0   ;;  %v90_v36 = vlaneseq }
   0xb   :  { %v41_v11 = vld [vmem:[%s1198_s1 + $0x28] sm:$0xff]  ;;  %v164_v12 = vld [vmem:[%s1199_s2 + $0x18] sm:$0xff]  ;;  %803 = vmatprep.subr.bf16.mxu0 %v887_v14  ;;  %v44_v15 = vld [vmem:[%s1198_s1 + $0x40] sm:$0xff]  ;;  %vm888_vm0 = vmmov 0   ;;  %v889_v30 = vmov 0.0   ;;  %vm324_vm1 = vcmask 588800  }
   0xc   :  { %v166_v13 = vld [vmem:[%s1199_s2 + $0x28] sm:$0xff]  ;;  %v163_v16 = vld [vmem:[%s1199_s2 + $0x10] sm:$0xff]  ;;  %v169_v17 = vld [vmem:[%s1199_s2 + $0x40] sm:$0xff]  ;;  %735 = vmatprep.mubr.msk.f32.mxu0 %vm888_vm0, %v889_v30  ;;  %v1042_v40 = vshrl.u32 %v90_v36, 7  ;;  %vm521_vm2 = vcmask 818176   ;;  %vm528_vm3 = vcmask 1043456  }
   0xd   :  { %128 = vperm.xlu0 %847, %v42_v6   ;;  %846 = vset.pattern.permute.xlu1 %v886_v8  ;;  %v247_v18 = vld [vmem:[%s1201_s4 + $0x8] sm:$0xff]  ;;  %v43_v19 = vld [vmem:[%s1198_s1 + $0x38] sm:$0xff]  ;;  %v165_v22 = vld [vmem:[%s1199_s2 + $0x20] sm:$0xff]  ;;  %vm623_vm4 = vcmask 1041408  }
   0xe   :  { %62 = vperm.xlu1 %846, %v39_v7   ;;  %v249_v20 = vld [vmem:[%s1201_s4 + $0x18] sm:$0xff]  ;;  %v251_v21 = vld [vmem:[%s1201_s4 + $0x28] sm:$0xff]  ;;  %v167_v24 = vld [vmem:[%s1199_s2 + $0x30] sm:$0xff]  ;;  %v141_v44 = vsub.s32 1, %v1042_v40  ;;  %v92_v45 = vsub.s32 0, %v1042_v40 }
   0xf   :  { %v253_v23 = vld [vmem:[%s1201_s4 + $0x38] sm:$0xff]  ;;  %v255_v25 = vld [vmem:[%s1201_s4 + $0x48] sm:$0xff]  ;;  %v632_v31 = vld [vmem:[#allocation2] sm:$0x1] }
  0x10   :  { %v168_v26 = vld [vmem:[%s1199_s2 + $0x38] sm:$0xff]  ;;  %v510_v28 = vld [vmem:[%s1203_s6 + $0x8] sm:$0x3]  ;;  %v246_v32 = vld [vmem:[%s1201_s4] sm:$0xff] }
  0x11   :  { %852 = vset.pattern.permute.xlu0 %v886_v8  ;;  %v257_v27 = vld [vmem:[%s1201_s4 + $0x58] sm:$0xff]  ;;  %v610_v29 = vld [vmem:[%s1204_s7 + $0x8] sm:$0x3]  ;;  %v248_v35 = vld [vmem:[%s1201_s4 + $0x10] sm:$0xff] }
  0x12   :  { %47 = vperm.xlu0 %852, %v36_v2   ;;  %848 = vset.pattern.permute.xlu1 %v885_v3  ;;  %v250_v39 = vld [vmem:[%s1201_s4 + $0x20] sm:$0xff]  ;;  %v252_v42 = vld [vmem:[%s1201_s4 + $0x30] sm:$0xff] }
  0x13   :  { %116 = vperm.xlu1 %848, %v39_v7   ;;  %v254_v46 = vld [vmem:[%s1201_s4 + $0x40] sm:$0xff]  ;;  %v256_v52 = vld [vmem:[%s1201_s4 + $0x50] sm:$0xff] }
  0x14   :  { %v35_v47 = vld [vmem:[%s1197_s0] sm:$0x3] }
  0x15   :  { %v1057_v50 = vrot.slane %v35_v47, %v141_v44  ;;  %v1061_v51 = vrot.slane %v35_v47, %v92_v45  ;;  %v258_v58 = vld [vmem:[%s1201_s4 + $0x60] sm:$0xf] }
  0x16   :  { %52 = vperm.xlu0 %852, %v37_v5   ;;  %v609_v7 = vld [vmem:[%s1204_s7] sm:$0xff] }
  0x17   :  { %849 = vset.pattern.permute.xlu1 %v886_v8 }
  0x18   :  { %172 = vperm.xlu1 %849, %v161_v9  }
  0x1a   :  { %57 = vperm.xlu0 %852, %v38_v1   ;;  %v509_v1 = vld [vmem:[%s1203_s6] sm:$0xff] }
  0x1c   :  { %67 = vperm.xlu1 %849, %v40_v4  }
  0x1e   :  { %177 = vperm.xlu0 %852, %v162_v10  }
  0x20   :  { %72 = vperm.xlu1 %849, %v41_v11  }
  0x22   :  { %187 = vperm.xlu0 %852, %v164_v12  }
  0x24   :  { %850 = vset.pattern.permute.xlu1 %v885_v3 }
  0x25   :  { %124 = vperm.xlu1 %850, %v41_v11  }
  0x26   :  { %197 = vperm.xlu0 %852, %v166_v13  }
  0x29   :  { %851 = vset.pattern.permute.xlu1 %v886_v8 }
  0x2a   :  { %87 = vperm.xlu0 %852, %v44_v15   ;;  %182 = vperm.xlu1 %851, %v163_v16  }
  0x2e   :  { %212 = vperm.xlu0 %852, %v169_v17   ;;  %77 = vperm.xlu1 %851, %v42_v6  }
  0x32   :  { %266 = vperm.xlu0 %852, %v247_v18   ;;  %82 = vperm.xlu1 %851, %v43_v19  }
  0x36   :  { %276 = vperm.xlu0 %852, %v249_v20   ;;  %853 = vset.pattern.permute.xlu1 %v885_v3 }
  0x37   :  { %132 = vperm.xlu1 %853, %v43_v19  }
  0x3a   :  { %286 = vperm.xlu0 %852, %v251_v21  }
  0x3b   :  { %854 = vset.pattern.permute.xlu1 %v886_v8 }
  0x3c   :  { %192 = vperm.xlu1 %854, %v165_v22  }
  0x3e   :  { %296 = vperm.xlu0 %852, %v253_v23  }
  0x40   :  { %202 = vperm.xlu1 %854, %v167_v24  }
  0x42   :  { %306 = vperm.xlu0 %852, %v255_v25  }
  0x44   :  { %207 = vperm.xlu1 %854, %v168_v26  }
  0x46   :  { %316 = vperm.xlu0 %852, %v257_v27  }
  0x48   :  { %855 = vset.pattern.permute.xlu1 %v885_v3 }
  0x49   :  { %136 = vperm.xlu1 %855, %v44_v15  }
  0x4a   :  { %518 = vperm.xlu0 %852, %v510_v28  }
  0x4d   :  { %856 = vset.pattern.permute.xlu1 %v886_v8 }
  0x4e   :  { %618 = vperm.xlu0 %852, %v610_v29   ;;  %261 = vperm.xlu1 %856, %v246_v32  }
  0x52   :  { %635 = vperm.xlu0 %852, %v632_v31   ;;  %271 = vperm.xlu1 %856, %v248_v35  }
  0x56   :  { %281 = vperm.xlu1 %856, %v250_v39  }
  0x5a   :  { %291 = vperm.xlu1 %856, %v252_v42  }
  0x5e   :  { %301 = vperm.xlu1 %856, %v254_v46  }
  0x62   :  { %311 = vperm.xlu1 %856, %v256_v52  }
  0x66   :  { %321 = vperm.xlu1 %856, %v258_v58  }
  0x6a   :  { %513 = vperm.xlu1 %856, %v509_v1  }
  0x6e   :  { %613 = vperm.xlu1 %856, %v609_v7   ;;  %v241_v7 = vld [vmem:[%s1200_s3 + $0x40] sm:$0xff] }
  0x84   :  { %v105_v33 = vpop.permute.xlu1 %104  ;;  %v113_v34 = vpop.permute.xlu0 %112 }
  0x85   :  { %v143_v56 = vmul.f32 %v1057_v50, %v105_v33  ;;  %v145_v10 = vmul.f32 %v1057_v50, %v113_v34 }
  0x88   :  { %v109_v37 = vpop.permute.xlu1 %108  ;;  %v1037_v38 = vpop.permute.xlu0 %120 }
  0x89   :  { %v144_v60 = vmul.f32 %v1057_v50, %v109_v37  ;;  %v147_v28 = vmul.f32 %v1057_v50, %v1037_v38 }
  0x8c   :  { %v1044_v41 = vpop.permute.xlu0 %128 }
  0x8d   :  { %v63_v43 = vpop.permute.xlu1 %62  ;;  %v149_v42 = vmul.f32 %v1057_v50, %v1044_v41 }
  0x8e   :  { %v97_v11 = vmul.f32 %v1061_v51, %v63_v43 }
  0x91   :  { %v48_v48 = vpop.permute.xlu0 %47 }
  0x92   :  { %v117_v49 = vpop.permute.xlu1 %116  ;;  %v94_v54 = vmul.f32 %v1061_v51, %v48_v48 }
  0x93   :  { %v146_v8 = vmul.f32 %v1057_v50, %v117_v49 }
  0x94   :  { %v152_v61 = vadd.f32 %v143_v56, %v94_v54 }
  0x95   :  { %v53_v53 = vpop.permute.xlu0 %52  ;;  %v155_v16 = vadd.f32 %v146_v8, %v97_v11  ;;  %v242_v8 = vld [vmem:[%s1200_s3 + $0x48] sm:$0xff]  ;;  %v245_v11 = vld [vmem:[%s1200_s3 + $0x60] sm:$0xf] }
  0x96   :  { %v95_v57 = vmul.f32 %v1061_v51, %v53_v53 }
  0x97   :  { %v173_v55 = vpop.permute.xlu1 %172 }
  0x98   :  { %v215_v63 = vadd.f32 %v173_v55, %v152_v61  ;;  %v153_v0 = vadd.f32 %v144_v60, %v95_v57 }
  0x99   :  { %v58_v59 = vpop.permute.xlu0 %57 }
  0x9a   :  { %v224_v5 = vmax.f32 %v215_v63, 0.0  ;;  %v96_v12 = vmul.f32 %v1061_v51, %v58_v59 }
  0x9b   :  { %v68_v62 = vpop.permute.xlu1 %67 }
  0x9c   :  { %v154_v18 = vadd.f32 %v145_v10, %v96_v12  ;;  %v98_v29 = vmul.f32 %v1061_v51, %v68_v62  ;;  %v244_v10 = vld [vmem:[%s1200_s3 + $0x58] sm:$0xff]  ;;  %v507_v12 = vld [vmem:[%s1202_s5] sm:$0xff] }
  0x9d   :  { %v178_v2 = vpop.permute.xlu0 %177  ;;  %800 = vmatprep.mubr.msk.f32.mxu1 %vm521_vm2, %v507_v12 }
  0x9e   :  { %v216_v3 = vadd.f32 %v178_v2, %v153_v0  ;;  %v156_v35 = vadd.f32 %v147_v28, %v98_v29  ;;  %v236_v2 = vld [vmem:[%s1200_s3 + $0x18] sm:$0xff] }
  0x9f   :  { %v73_v4 = vpop.permute.xlu1 %72 }
  0xa0   :  { %v225_v6 = vmax.f32 %v216_v3, 0.0  ;;  %v99_v27 = vmul.f32 %v1061_v51, %v73_v4  ;;  %v237_v3 = vld [vmem:[%s1200_s3 + $0x20] sm:$0xff]  ;;  %v238_v4 = vld [vmem:[%s1200_s3 + $0x28] sm:$0xff] }
  0xa1   :  { %v188_v15 = vpop.permute.xlu0 %187 }
  0xa2   :  { %v804_v9 = vpack.c.bf16 %v225_v6, %v224_v5  ;;  %v218_v17 = vadd.f32 %v188_v15, %v155_v16  ;;  %v239_v5 = vld [vmem:[%s1200_s3 + $0x30] sm:$0xff]  ;;  %v240_v6 = vld [vmem:[%s1200_s3 + $0x38] sm:$0xff] }
  0xa4   :  { %v125_v13 = vpop.permute.xlu1 %124  ;;  %805 = vmatpush3.bf16.msra.mxu0 %v804_v9  ;;  %v227_v21 = vmax.f32 %v218_v17, 0.0  ;;  %v243_v9 = vld [vmem:[%s1200_s3 + $0x50] sm:$0xff] }
  0xa5   :  { %806 = vmatprep.subr.bf16.mxu0 %v887_v14  ;;  %v148_v26 = vmul.f32 %v1057_v50, %v125_v13  ;;  %v198_v33 = vpop.permute.xlu0 %197 }
  0xa7   :  { %v157_v31 = vadd.f32 %v148_v26, %v99_v27 }
  0xa9   :  { %v183_v19 = vpop.permute.xlu1 %182  ;;  %v220_v34 = vadd.f32 %v198_v33, %v157_v31  ;;  %v88_v56 = vpop.permute.xlu0 %87 }
  0xaa   :  { %v217_v20 = vadd.f32 %v183_v19, %v154_v18  ;;  %v102_v60 = vmul.f32 %v1061_v51, %v88_v56 }
  0xab   :  { %v229_v43 = vmax.f32 %v220_v34, 0.0 }
  0xac   :  { %v226_v22 = vmax.f32 %v217_v20, 0.0 }
  0xad   :  { %v78_v23 = vpop.permute.xlu1 %77  ;;  %v213_v63 = vpop.permute.xlu0 %212 }
  0xae   :  { %v807_v24 = vpack.c.bf16 %v227_v21, %v226_v22  ;;  %v100_v37 = vmul.f32 %v1061_v51, %v78_v23 }
  0xb0   :  { %808 = vmatpush3.bf16.msra.mxu0 %v807_v24  ;;  %v158_v49 = vadd.f32 %v149_v42, %v100_v37 }
  0xb1   :  { %v83_v25 = vpop.permute.xlu1 %82  ;;  %809 = vmatprep.subr.bf16.mxu0 %v887_v14  ;;  %v267_v18 = vpop.permute.xlu0 %266 }
  0xb2   :  { %v101_v38 = vmul.f32 %v1061_v51, %v83_v25  ;;  %v235_v51 = vld [vmem:[%s1200_s3 + $0x10] sm:$0xff] }
  0xb5   :  { %v277_v28 = vpop.permute.xlu0 %276 }
  0xb6   :  { %v133_v32 = vpop.permute.xlu1 %132 }
  0xb7   :  { %v150_v44 = vmul.f32 %v1057_v50, %v133_v32 }
  0xb9   :  { %v159_v53 = vadd.f32 %v150_v44, %v101_v38 }
  0xbb   :  { %v193_v36 = vpop.permute.xlu1 %192 }
  0xbc   :  { %v219_v39 = vadd.f32 %v193_v36, %v156_v35 }
  0xbe   :  { %v228_v46 = vmax.f32 %v219_v39, 0.0 }
  0xbf   :  { %v203_v47 = vpop.permute.xlu1 %202 }
  0xc0   :  { %v810_v48 = vpack.c.bf16 %v229_v43, %v228_v46  ;;  %v221_v52 = vadd.f32 %v203_v47, %v158_v49  ;;  %v287_v43 = vpop.permute.xlu0 %286 }
  0xc2   :  { %811 = vmatpush3.bf16.msra.mxu0 %v810_v48  ;;  %v230_v57 = vmax.f32 %v221_v52, 0.0 }
  0xc3   :  { %v208_v54 = vpop.permute.xlu1 %207  ;;  %812 = vmatprep.subr.bf16.mxu0 %v887_v14  ;;  %v233_v14 = vld [vmem:[%s1200_s3] sm:$0xff] }
  0xc4   :  { %v222_v55 = vadd.f32 %v208_v54, %v159_v53  ;;  %v297_v56 = vpop.permute.xlu0 %296 }
  0xc6   :  { %v231_v58 = vmax.f32 %v222_v55, 0.0 }
  0xc8   :  { %v813_v41 = vpack.c.bf16 %v231_v58, %v230_v57  ;;  %v137_v59 = vpop.permute.xlu1 %136 }
  0xc9   :  { %v151_v61 = vmul.f32 %v1057_v50, %v137_v59  ;;  %v234_v50 = vld [vmem:[%s1200_s3 + $0x8] sm:$0xff] }
  0xca   :  { %814 = vmatpush3.bf16.msra.mxu0 %v813_v41 }
  0xcb   :  { %v160_v62 = vadd.f32 %v151_v61, %v102_v60  ;;  %733 = vmatprep.subr.mxu0 %v889_v30 }
  0xcd   :  { %v223_v0 = vadd.f32 %v213_v63, %v160_v62  ;;  %v262_v16 = vpop.permute.xlu1 %261 }
  0xcf   :  { %v232_v1 = vmax.f32 %v223_v0, 0.0 }
  0xd1   :  { %734 = vmatpush3.msra.mxu0 %v232_v1  ;;  %v272_v26 = vpop.permute.xlu1 %271 }
  0xd2   :  { %736 = vmatmul.mubr.msk.f32.vlgmr.msra.gmra.mrb[0].mxu0 %vm324_vm1, %v233_v14  ;;  %v307_v14 = vpop.permute.xlu0 %306 }
  0xd3   :  { %738 = vmatprep.mubr.msk.f32.mxu0 %vm888_vm0, %v889_v30 }
  0xd5   :  { %v282_v39 = vpop.permute.xlu1 %281 }
  0xd6   :  { %739 = vmatmul.mubr.msk.f32.gmra.mrb[2].mxu0 %vm324_vm1, %v234_v50 }
  0xd7   :  { %741 = vmatprep.mubr.msk.f32.mxu0 %vm888_vm0, %v889_v30 }
  0xd9   :  { %v292_v54 = vpop.permute.xlu1 %291 }
  0xda   :  { %742 = vmatmul.mubr.msk.f32.gmra.mrb[4].mxu0 %vm324_vm1, %v235_v51 }
  0xdb   :  { %744 = vmatprep.mubr.msk.f32.mxu0 %vm888_vm0, %v889_v30 }
  0xdd   :  { %v302_v0 = vpop.permute.xlu1 %301 }
  0xde   :  { %745 = vmatmul.mubr.msk.f32.gmra.mrb[6].mxu0 %vm324_vm1, %v236_v2 }
  0xdf   :  { %747 = vmatprep.mubr.msk.f32.mxu0 %vm888_vm0, %v889_v30 }
  0xe2   :  { %748 = vmatmul.mubr.msk.f32.gmra.mrb[8].mxu0 %vm324_vm1, %v237_v3 }
  0xe3   :  { %750 = vmatprep.mubr.msk.f32.mxu0 %vm888_vm0, %v889_v30 }
  0xe6   :  { %751 = vmatmul.mubr.msk.f32.gmra.mrb[10].mxu0 %vm324_vm1, %v238_v4 }
  0xe7   :  { %753 = vmatprep.mubr.msk.f32.mxu0 %vm888_vm0, %v889_v30 }
  0xea   :  { %754 = vmatmul.mubr.msk.f32.gmra.mrb[12].mxu0 %vm324_vm1, %v239_v5 }
  0xeb   :  { %756 = vmatprep.mubr.msk.f32.mxu0 %vm888_vm0, %v889_v30 }
  0xee   :  { %757 = vmatmul.mubr.msk.f32.gmra.mrb[14].mxu0 %vm324_vm1, %v240_v6 }
  0xef   :  { %759 = vmatprep.mubr.msk.f32.mxu0 %vm888_vm0, %v889_v30 }
  0xf2   :  { %760 = vmatmul.mubr.msk.f32.gmra.mrb[16].mxu0 %vm324_vm1, %v241_v7 }
  0xf3   :  { %762 = vmatprep.mubr.msk.f32.mxu0 %vm888_vm0, %v889_v30 }
  0xf6   :  { %763 = vmatmul.mubr.msk.f32.gmra.mrb[18].mxu0 %vm324_vm1, %v242_v8  ;;  %v312_v8 = vpop.permute.xlu1 %311 }
  0xf7   :  { %765 = vmatprep.mubr.msk.f32.mxu0 %vm888_vm0, %v889_v30 }
  0xfa   :  { %766 = vmatmul.mubr.msk.f32.gmra.mrb[20].mxu0 %vm324_vm1, %v243_v9 }
  0xfb   :  { %768 = vmatprep.mubr.msk.f32.mxu0 %vm888_vm0, %v889_v30 }
  0xfe   :  { %769 = vmatmul.mubr.msk.f32.gmra.mrb[22].mxu0 %vm324_vm1, %v244_v10  ;;  %v317_v10 = vpop.permute.xlu0 %316 }
  0xff   :  { %771 = vmatprep.mubr.msk.f32.mxu0 %vm888_vm0, %v889_v30 }
 0x102   :  { %772 = vmatmul.mubr.msk.f32.gmra.mrb[24].mxu0 %vm324_vm1, %v245_v11 }
 0x1a5   :  { %v430_v13 = vpop.f32.mrb[0].mxu0 }
 0x1a6   :  { %v737_v15 = vpop.f32.mrb[1].mxu0  ;;  %v431_v17 = vadd.f32 %v430_v13, %v262_v16 }
 0x1a8   :  { %v494_v21 = vmax.f32 %v431_v17, 0.0  ;;  %v322_v17 = vpop.permute.xlu1 %321 }
 0x1a9   :  { %v435_v19 = vpop.f32.mrb[2].mxu0 }
 0x1aa   :  { %v436_v30 = vadd.f32 %v435_v19, %v267_v18  ;;  %v740_v20 = vpop.f32.mrb[3].mxu0 }
 0x1ac   :  { %v495_v22 = vmax.f32 %v436_v30, 0.0 }
 0x1ad   :  { %v440_v23 = vpop.f32.mrb[4].mxu0 }
 0x1ae   :  { %v743_v24 = vpop.f32.mrb[5].mxu0  ;;  %v815_v25 = vpack.c.bf16 %v495_v22, %v494_v21  ;;  %v441_v27 = vadd.f32 %v440_v23, %v272_v26  ;;  %v508_v22 = vld [vmem:[%s1202_s5 + $0x8] sm:$0x3]  ;;  %v519_v23 = vpop.permute.xlu0 %518  ;;  %s890_s5 = smov [#allocation3]  }
 0x1af   :  { %v514_v24 = vpop.permute.xlu1 %513  ;;  %s656_s7 = sshll.u32 %s890_s5, 4  ;;  %s657_s7 = int_to_ptr.vmem [resolvable:$true] %s656_s7 }
 0x1b0   :  { %816 = vmatprep.subr.bf16.mxu1 %v815_v25  ;;  %v496_v33 = vmax.f32 %v441_v27, 0.0  ;;  %s861_s12 = scalar_lea.vmem %s657_s7, 16  ;;  %s865_s13 = scalar_lea.vmem %s657_s7, 32 }
 0x1b1   :  { %v445_v29 = vpop.f32.mrb[6].mxu0  ;;  %818 = vmatpush3.bf16.msra.mxu1 %v815_v25  ;;  %p862_p0 = scmp.ne.s32.totalorder %s657_s7, %s861_s12  ;;  %p866_p1 = scmp.lt.s32.totalorder %s657_s7, %s657_s7 }
 0x1b2   :  { %v446_v31 = vadd.f32 %v445_v29, %v277_v28  ;;  %v746_v32 = vpop.f32.mrb[7].mxu0  ;;  %p867_p2 = scmp.lt.s32.totalorder %s865_s13, %s861_s12 }
 0x1b4   :  { %v497_v34 = vmax.f32 %v446_v31, 0.0  ;;  %v619_v31 = vpop.permute.xlu0 %618  ;;  %p868_p3 = por %p867_p2, %p866_p1 }
 0x1b5   :  { %v450_v35 = vpop.f32.mrb[8].mxu0 }
 0x1b6   :  { %v819_v36 = vpack.c.bf16 %v497_v34, %v496_v33  ;;  %v749_v37 = vpop.f32.mrb[9].mxu0  ;;  %v451_v42 = vadd.f32 %v450_v35, %v282_v39  ;;  %v614_v33 = vpop.permute.xlu1 %613  ;;  %p869_p4 = pnand %p868_p3, %p862_p0 }
 0x1b8   :  { %820 = vmatprep.subr.bf16.mxu1 %v819_v36  ;;  %v498_v38 = vmax.f32 %v451_v42, 0.0 }
 0x1b9   :  { %v455_v44 = vpop.f32.mrb[10].mxu0  ;;  %822 = vmatpush3.bf16.msra.mxu1 %v819_v36 }
 0x1ba   :  { %v456_v46 = vadd.f32 %v455_v44, %v287_v43  ;;  %v752_v47 = vpop.f32.mrb[11].mxu0 }
 0x1bc   :  { %v499_v48 = vmax.f32 %v456_v46, 0.0  ;;  %v636_v46 = vpop.permute.xlu0 %635 }
 0x1bd   :  { %v460_v49 = vpop.f32.mrb[12].mxu0 }
 0x1be   :  { %v823_v52 = vpack.c.bf16 %v499_v48, %v498_v38  ;;  %v755_v53 = vpop.f32.mrb[13].mxu0  ;;  %v461_v55 = vadd.f32 %v460_v49, %v292_v54  ;;  %v641_v38 = vrot.slane %v636_v46, %v92_v45 }
 0x1c0   :  { %824 = vmatprep.subr.bf16.mxu1 %v823_v52  ;;  %v500_v59 = vmax.f32 %v461_v55, 0.0 }
 0x1c1   :  { %v465_v57 = vpop.f32.mrb[14].mxu0  ;;  %826 = vmatpush3.bf16.msra.mxu1 %v823_v52 }
 0x1c2   :  { %v466_v58 = vadd.f32 %v465_v57, %v297_v56  ;;  %v758_v41 = vpop.f32.mrb[15].mxu0 }
 0x1c4   :  { %v501_v60 = vmax.f32 %v466_v58, 0.0 }
 0x1c5   :  { %v470_v61 = vpop.f32.mrb[16].mxu0 }
 0x1c6   :  { %v827_v62 = vpack.c.bf16 %v501_v60, %v500_v59  ;;  %v761_v63 = vpop.f32.mrb[17].mxu0  ;;  %v471_v1 = vadd.f32 %v470_v61, %v302_v0 }
 0x1c8   :  { %828 = vmatprep.subr.bf16.mxu1 %v827_v62  ;;  %v502_v3 = vmax.f32 %v471_v1, 0.0 }
 0x1c9   :  { %v475_v50 = vpop.f32.mrb[18].mxu0  ;;  %830 = vmatpush3.bf16.msra.mxu1 %v827_v62 }
 0x1ca   :  { %v476_v51 = vadd.f32 %v475_v50, %v307_v14  ;;  %v764_v2 = vpop.f32.mrb[19].mxu0 }
 0x1cc   :  { %v503_v4 = vmax.f32 %v476_v51, 0.0 }
 0x1cd   :  { %v480_v5 = vpop.f32.mrb[20].mxu0 }
 0x1ce   :  { %v831_v6 = vpack.c.bf16 %v503_v4, %v502_v3  ;;  %v767_v7 = vpop.f32.mrb[21].mxu0  ;;  %v481_v9 = vadd.f32 %v480_v5, %v312_v8 }
 0x1d0   :  { %832 = vmatprep.subr.bf16.mxu1 %v831_v6  ;;  %v504_v15 = vmax.f32 %v481_v9, 0.0 }
 0x1d1   :  { %v485_v11 = vpop.f32.mrb[22].mxu0  ;;  %834 = vmatpush3.bf16.msra.mxu1 %v831_v6 }
 0x1d2   :  { %v486_v12 = vadd.f32 %v485_v11, %v317_v10  ;;  %v770_v13 = vpop.f32.mrb[23].mxu0 }
 0x1d4   :  { %v505_v16 = vmax.f32 %v486_v12, 0.0 }
 0x1d5   :  { %v490_v18 = vpop.f32.mrb[24].mxu0 }
 0x1d6   :  { %v835_v19 = vpack.c.bf16 %v505_v16, %v504_v15  ;;  %v491_v30 = vadd.f32 %v490_v18, %v322_v17  ;;  %v773_v20 = vpop.f32.mrb[25].mxu0 }
 0x1d8   :  { %v506_v21 = vmax.f32 %v491_v30, 0.0  ;;  %836 = vmatprep.subr.bf16.mxu1 %v835_v19 }
 0x1d9   :  { %838 = vmatpush3.bf16.msra.mxu1 %v835_v19 }
 0x1da   :  { %798 = vmatprep.subr.msk.mxu1 %vm528_vm3, %v506_v21 }
 0x1dd   :  { %799 = vmatpush3.msk.msra.mxu1 %vm528_vm3, %v506_v21 }
 0x1de   :  { %801 = vmatmul.mubr.msk.f32.vlgmr.msra.gmra.mrb[0].mxu1 %vm521_vm2, %v508_v22 }
 0x2b1   :  { %v802_v25 = vpop.f32.mrb[0].mxu1 }
 0x2b2   :  { %v604_v26 = vadd.f32 %v802_v25, %v519_v23  ;;  %v598_v27 = vpop.f32.mrb[1].mxu1 }
 0x2b3   :  { %v599_v28 = vadd.f32 %v598_v27, %v514_v24 }
 0x2b4   :  { %v608_v29 = vmax.f32 %v604_v26, 0.0 }
 0x2b5   :  { %v607_v32 = vmax.f32 %v599_v28, 0.0 }
 0x2b6   :  { %v622_v34 = vmul.f32 %v619_v31, %v608_v29 }
 0x2b7   :  { %v621_v35 = vmul.f32 %v614_v33, %v607_v32 }
 0x2b8   :  { %v624_v36 = vsel %vm623_vm4, %v622_v34, 0.0 }
 0x2b9   :  { %v625_v37 = vadd.f32 %v624_v36, %v621_v35 }
 0x2bb   :  { %v626_v39 = vrot.slane %v625_v37, 4 }
 0x2bd   :  { %v627_v42 = vadd.f32 %v626_v39, %v625_v37 }
 0x2bf   :  { %v628_v43 = vrot.slane %v627_v42, 2 }
 0x2c1   :  { %v629_v44 = vadd.f32 %v628_v43, %v627_v42 }
 0x2c3   :  { %v630_v47 = vrot.slane %v629_v44, 1 }
 0x2c5   :  { %v631_v48 = vadd.f32 %v630_v47, %v629_v44 }
 0x2c7   :  { %v642_v49 = vadd.f32 %v641_v38, %v631_v48 }
 0x2c9   :  { %v643_v52 = vsub.f32 0.0, %v642_v49 }
 0x2cb   :  { %v644_v53 = vmul.f32 1.442695, %v643_v52 }
 0x2cd   :  { %857 = vpow2.f32 %v644_v53 }
 0x2d7   :  { %v858_v54 = vpop.eup %857 }
 0x2d8   :  { %v646_v55 = vadd.f32 1.0, %v858_v54 }
 0x2da   :  { %859 = vrcp.f32 %v646_v55 }
 0x2e4   :  { %v860_v56 = vpop.eup %859 }
 0x2e5   :  { %649 = vst [vmem:[#allocation3] sm:$0x1] %v860_v56 }
 0x2e6   :  { %872 = shalt.err (!%p869_p4)
}
 0x2e7   :  { %s873_s16 = scalar_lea.hbm %s1206_s9, 16 }
 0x2e8   :  { %p874_p5 = scmp.ne.s32.totalorder %s1206_s9, %s873_s16  ;;  %p877_p6 = scmp.lt.u32.totalorder %s873_s16, %s1206_s9 }
 0x2ea   :  { %p879_p7 = pnand %p877_p6, %p874_p5 }
 0x2ec   :  { %882 = shalt.err (!%p879_p7)
}
 0x2ed   :  { %659 = dma.vmem_to_hbm [thread:$0]  %s657_s7, 16, %s1206_s9, [#allocation4]  }
 0x2ee   :  { %883 = dma.done.wait [#allocation4], 16  }
 0x2ef   :  { %884 = vsyncadd [#allocation4], 4294967280 }
 0x2f0   :  { %663 = vsyncpa [#allocation4], 1 }

</bundles_post_ra>
